<compile_context>
chip_gen: v6e
topology: v6e:2x2x1
jax: 0.10.0
libtpu: 0.0.40
codegen_flags: <defaults>
</compile_context>

<pallas_src>
import jax
import jax.numpy as jnp
from jax.experimental import pallas as pl
from jax.experimental.pallas import tpu as pltpu

_SMOOTH = 1e-5
_LANES = 128           # lane width of a vreg
_MAX_TILE_ROWS = 4096  # 4096 * 128 * 4B = 2 MiB per input tile (fits all chips)


def _dice_partial_kernel(out_ref, tgt_ref, sums_ref):
    """Accumulate (intersection, sum(binary)+sum(target)) across row tiles."""
    i = pl.program_id(0)

    @pl.when(i == 0)
    def _():
        sums_ref[0, 0] = 0.0
        sums_ref[0, 1] = 0.0

    mask = out_ref[...] > 0.1                      # np.where(output > 0.1, 1, 0)
    tgt = tgt_ref[...].astype(jnp.float32)         # accumulate in f32

    # Fused reductions (3 -> 2):
    #   intersection           = sum(binary * tgt) = sum(where(mask, tgt, 0))
    #   sum(binary) + sum(tgt) = sum(where(mask, tgt + 1, tgt))
    inter = jnp.sum(jnp.where(mask, tgt, 0.0))
    denom = jnp.sum(jnp.where(mask, tgt + 1.0, tgt))

    sums_ref[0, 0] += inter
    sums_ref[0, 1] += denom


def dice_eva(output, target):
    """Pallas implementation of DiceEva.forward(output, target)."""
    # Glue (plain JAX, static-shape work only).
    tgt_flat = target[0, 0, :, :].reshape(-1)
    out_flat = output.reshape(-1)
    if out_flat.shape[0] != tgt_flat.shape[0]:
        # The numpy reference implicitly requires matching flattened sizes
        # (elementwise multiply of two 1-D arrays).
        raise ValueError(
            f"output has {out_flat.shape[0]} elements but target[0,0,:,:] has "
            f"{tgt_flat.shape[0]}; DiceEva requires them to match."
        )

    n = out_flat.shape[0]
    rows = -(-n // _LANES)                              # ceil(n / 128)
    tile_rows = min(_MAX_TILE_ROWS, ((rows + 7) // 8) * 8)  # multiple of 8
    num_tiles = -(-rows // tile_rows)
    padded_rows = num_tiles * tile_rows
    pad = padded_rows * _LANES - n

    # Zero padding is safe: pad output with 0.0 (never passes the >0.1
    # threshold) and target with 0.0 (adds nothing to the sums).
    out2d = jnp.pad(out_flat, (0, pad)).reshape(padded_rows, _LANES)
    tgt2d = jnp.pad(tgt_flat, (0, pad)).reshape(padded_rows, _LANES)

    sums = pl.pallas_call(
        _dice_partial_kernel,
        out_shape=jax.ShapeDtypeStruct((1, 2), jnp.float32),
        grid=(num_tiles,),
        in_specs=[
            pl.BlockSpec((tile_rows, _LANES), lambda i: (i, 0)),
            pl.BlockSpec((tile_rows, _LANES), lambda i: (i, 0)),
        ],
        out_specs=pl.BlockSpec(memory_space=pltpu.MemorySpace.SMEM),
        compiler_params=pltpu.CompilerParams(
            dimension_semantics=("arbitrary",),
            vmem_limit_bytes=32 * 1024 * 1024,
        ),
    )(out2d, tgt2d)

    # Final scalar combine (trivial; done outside the kernel).
    return (2.0 * sums[0, 0] + _SMOOTH) / (sums[0, 1] + _SMOOTH)


if __name__ == "__main__":
    key = jax.random.PRNGKey(0)
    k1, k2 = jax.random.split(key)

    # Small shapes consistent with the forward:
    #   output: prediction map whose flatten() has H*W elements -> (1, 1, 16, 16)
    #   target: NCHW tensor; only the [0, 0, :, :] slice is used -> (2, 4, 16, 16)
    output = jax.random.uniform(k1, (1, 1, 16, 16), dtype=jnp.float32)
    target = (jax.random.uniform(k2, (2, 4, 16, 16), dtype=jnp.float32) > 0.5).astype(
        jnp.float32
    )

    dice = jax.block_until_ready(dice_eva(output, target))

    # Pure-JAX reference for a sanity check (mirrors the numpy code exactly).
    tgt_flat = target[0, 0, :, :].reshape(-1)
    out_flat = jnp.where(output > 0.1, 1.0, 0.0).reshape(-1)
    ref = (2.0 * jnp.sum(out_flat * tgt_flat) + _SMOOTH) / (
        jnp.sum(out_flat) + jnp.sum(tgt_flat) + _SMOOTH
    )
    assert jnp.allclose(dice, ref, rtol=1e-5, atol=1e-6), (dice, ref)

    print("KERNEL_OK")
</pallas_src>

<mosaic_0001>
module attributes {stable_mosaic.version = 11 : i64} {
  func.func @_dice_partial_kernel(%arg0: i32, %arg1: memref<8x128xf32, #tpu.memory_space<vmem>>, %arg2: memref<8x128xf32, #tpu.memory_space<vmem>>, %arg3: memref<1x2xf32, #tpu.memory_space<smem>>) attributes {dimension_semantics = [#tpu.dimension_semantics<arbitrary>], iteration_bounds = array<i64: 1>, scalar_prefetch = 0 : i64, scratch_operands = 0 : i64, tpu.core_type = #tpu.core_type<tc>, window_params = [{transform_indices = @transform_0, window_bounds = array<i64: 8, 128>}, {transform_indices = @transform_1, window_bounds = array<i64: 8, 128>}, {transform_indices = @transform_2, window_bounds = array<i64: 1, 2>}]} {
    %c0_i32 = arith.constant 0 : i32
    %0 = arith.cmpi eq, %arg0, %c0_i32 : i32
    %1 = arith.extui %0 : i1 to i32
    %c0_i32_0 = arith.constant 0 : i32
    %2 = arith.cmpi ne, %1, %c0_i32_0 : i32
    scf.if %2 {
      %cst_15 = arith.constant 0.000000e+00 : f32
      %c0_16 = arith.constant 0 : index
      %c0_17 = arith.constant 0 : index
      %26 = memref.load %arg3[%c0_16, %c0_17] : memref<1x2xf32, #tpu.memory_space<smem>>
      memref.store %cst_15, %arg3[%c0_16, %c0_17] : memref<1x2xf32, #tpu.memory_space<smem>>
      %cst_18 = arith.constant 0.000000e+00 : f32
      %c0_19 = arith.constant 0 : index
      %c1_20 = arith.constant 1 : index
      %27 = memref.load %arg3[%c0_19, %c1_20] : memref<1x2xf32, #tpu.memory_space<smem>>
      memref.store %cst_18, %arg3[%c0_19, %c1_20] : memref<1x2xf32, #tpu.memory_space<smem>>
    } else {
    }
    %c0 = arith.constant 0 : index
    %c0_1 = arith.constant 0 : index
    %3 = vector.load %arg1[%c0, %c0_1] : memref<8x128xf32, #tpu.memory_space<vmem>>, vector<8x128xf32>
    %cst = arith.constant 1.000000e-01 : f32
    %4 = vector.broadcast %cst : f32 to vector<8x128xf32>
    %5 = arith.cmpf ogt, %3, %4 : vector<8x128xf32>
    %c0_2 = arith.constant 0 : index
    %c0_3 = arith.constant 0 : index
    %6 = vector.load %arg2[%c0_2, %c0_3] : memref<8x128xf32, #tpu.memory_space<vmem>>, vector<8x128xf32>
    %cst_4 = arith.constant 0.000000e+00 : f32
    %7 = vector.broadcast %cst_4 : f32 to vector<8x128xf32>
    %8 = arith.select %5, %6, %7 : vector<8x128xi1>, vector<8x128xf32>
    %9 = vector.shape_cast %8 : vector<8x128xf32> to vector<1x8x128xf32>
    %cst_5 = arith.constant dense<0.000000e+00> : vector<1xf32>
    %10 = vector.multi_reduction <add>, %9, %cst_5 [1, 2] : vector<1x8x128xf32> to vector<1xf32>
    %11 = vector.shape_cast %10 : vector<1xf32> to vector<1x1x1xf32>
    %12 = vector.extract %11[0, 0, 0] : f32 from vector<1x1x1xf32>
    %cst_6 = arith.constant 1.000000e+00 : f32
    %13 = vector.broadcast %cst_6 : f32 to vector<8x128xf32>
    %14 = arith.addf %6, %13 : vector<8x128xf32>
    %15 = arith.select %5, %14, %6 : vector<8x128xi1>, vector<8x128xf32>
    %16 = vector.shape_cast %15 : vector<8x128xf32> to vector<1x8x128xf32>
    %cst_7 = arith.constant dense<0.000000e+00> : vector<1xf32>
    %17 = vector.multi_reduction <add>, %16, %cst_7 [1, 2] : vector<1x8x128xf32> to vector<1xf32>
    %18 = vector.shape_cast %17 : vector<1xf32> to vector<1x1x1xf32>
    %19 = vector.extract %18[0, 0, 0] : f32 from vector<1x1x1xf32>
    %c0_8 = arith.constant 0 : index
    %c0_9 = arith.constant 0 : index
    %20 = memref.load %arg3[%c0_8, %c0_9] : memref<1x2xf32, #tpu.memory_space<smem>>
    %21 = arith.addf %20, %12 : f32
    %c0_10 = arith.constant 0 : index
    %c0_11 = arith.constant 0 : index
    %22 = memref.load %arg3[%c0_10, %c0_11] : memref<1x2xf32, #tpu.memory_space<smem>>
    memref.store %21, %arg3[%c0_10, %c0_11] : memref<1x2xf32, #tpu.memory_space<smem>>
    %c0_12 = arith.constant 0 : index
    %c1 = arith.constant 1 : index
    %23 = memref.load %arg3[%c0_12, %c1] : memref<1x2xf32, #tpu.memory_space<smem>>
    %24 = arith.addf %23, %19 : f32
    %c0_13 = arith.constant 0 : index
    %c1_14 = arith.constant 1 : index
    %25 = memref.load %arg3[%c0_13, %c1_14] : memref<1x2xf32, #tpu.memory_space<smem>>
    memref.store %24, %arg3[%c0_13, %c1_14] : memref<1x2xf32, #tpu.memory_space<smem>>
    return
  }
  func.func @transform_0(%arg0: i32) -> (i32, i32) {
    %c0_i32 = arith.constant 0 : i32
    %c0_i32_0 = arith.constant 0 : i32
    return %arg0, %c0_i32 : i32, i32
  }
  func.func @transform_1(%arg0: i32) -> (i32, i32) {
    %c0_i32 = arith.constant 0 : i32
    %c0_i32_0 = arith.constant 0 : i32
    return %arg0, %c0_i32 : i32, i32
  }
  func.func @transform_2(%arg0: i32) -> (i32, i32) {
    %c0_i32 = arith.constant 0 : i32
    %c0_i32_0 = arith.constant 0 : i32
    %c0_i32_1 = arith.constant 0 : i32
    return %c0_i32, %c0_i32_0 : i32, i32
  }
}

</mosaic_0001>

<bundles_post_ra>
// kernel: tpu_custom_call.1
= control target key start
LH: loop header
LB: loop body
LE: loop exit
PB: predicated region body
PF: predicated region fallthrough
CT: control target
= control target key end

     0   :  { %7 = vsyncpa [#allocation3], 0  ;;  %s181_s0 = inlined_call_operand.hbm [shape: f32[8,128], index: 0, kind: input, shape index: {}]   ;;  %s182_s1 = inlined_call_operand.hbm [shape: f32[8,128], index: 1, kind: input, shape index: {}]   ;;  %s183_s2 = inlined_call_operand.hbm [shape: f32[1,2], index: 2, kind: output, shape index: {}]  }
   0x1   :  { %8 = vsyncpa [#allocation6], 0 }
   0x2   :  { %9 = vsyncpa [#allocation4], 0  ;;  %s154_s9 = smov [#allocation2]   ;;  %s155_s11 = smov [#allocation5]  }
   0x3   :  { %s16_s10 = sshll.u32 %s154_s9, 4  ;;  %s26_s12 = sshll.u32 %s155_s11, 4  ;;  %s17_s10 = int_to_ptr.vmem [resolvable:$true] %s16_s10  ;;  %s27_s12 = int_to_ptr.vmem [resolvable:$true] %s26_s12 }
   0x4   :  { %s108_s13 = scalar_lea.vmem %s17_s10, 128  ;;  %p113_p1 = scmp.lt.s32.totalorder %s17_s10, %s17_s10 }
   0x5   :  { %p109_p0 = scmp.ne.s32.totalorder %s17_s10, %s108_s13  ;;  %p114_p2 = scmp.lt.s32.totalorder %s108_s13, %s108_s13 }
   0x7   :  { %p115_p3 = por %p114_p2, %p113_p1 }
   0x9   :  { %p116_p4 = pnand %p115_p3, %p109_p0 }
   0xb   :  { %119 = shalt.err (!%p116_p4)
}
   0xc   :  { %19 = dma.hbm_to_vmem [thread:$0]  %s181_s0, 128, %s17_s10, [#allocation3]  }
   0xd   :  { %s128_s16 = scalar_lea.vmem %s27_s12, 128  ;;  %p133_p6 = scmp.lt.s32.totalorder %s27_s12, %s27_s12 }
   0xe   :  { %p129_p5 = scmp.ne.s32.totalorder %s27_s12, %s128_s16  ;;  %p134_p7 = scmp.lt.s32.totalorder %s128_s16, %s128_s16 }
  0x10   :  { %p135_p8 = por %p134_p7, %p133_p6 }
  0x12   :  { %p136_p9 = pnand %p135_p8, %p129_p5 }
  0x14   :  { %139 = shalt.err (!%p136_p9)
}
  0x15   :  { %29 = dma.hbm_to_vmem [thread:$0]  %s182_s1, 128, %s27_s12, [#allocation6]  }
  0x16   :  { %148 = dma.done.wait [#allocation3], 128  }
  0x17   :  { %149 = vsyncadd [#allocation3], 4294967168 }
  0x18   :  { %150 = dma.done.wait [#allocation6], 128  }
  0x19   :  { %151 = vsyncadd [#allocation6], 4294967168  ;;  %v44_v0 = vld [vmem:[#allocation2] sm:$0xff]  ;;  %v46_v1 = vld [vmem:[#allocation5] sm:$0xff]  ;;  %s156_s19 = smov [#allocation7]  }
  0x1a   :  { %vm45_vm0 = vcmp.gt.f32.partialorder %v44_v0, 0.1  ;;  %v57_v2 = vadd.f32 1.0, %v46_v1 }
  0x1b   :  { %v47_v3 = vsel %vm45_vm0, %v46_v1, 0.0 }
  0x1c   :  { %48 = vadd.xlane.f32.xlu0 %v47_v3  ;;  %v58_v4 = vsel %vm45_vm0, %v57_v2, %v46_v1 }
  0x20   :  { %59 = vadd.xlane.f32.xlu0 %v58_v4 }
  0xa5   :  { %v49_v5 = vpop.xlane.xlu0 %48 }
  0xa6   :  { %v50_v6 = vrot.slane %v49_v5, 4 }
  0xa8   :  { %v51_v7 = vadd.f32 %v50_v6, %v49_v5 }
  0xa9   :  { %v60_v8 = vpop.xlane.xlu0 %59 }
  0xaa   :  { %v52_v9 = vrot.slane %v51_v7, 2  ;;  %v61_v10 = vrot.slane %v60_v8, 4 }
  0xac   :  { %v62_v11 = vadd.f32 %v61_v10, %v60_v8  ;;  %v53_v12 = vadd.f32 %v52_v9, %v51_v7 }
  0xae   :  { %v63_v13 = vrot.slane %v62_v11, 2  ;;  %v54_v14 = vrot.slane %v53_v12, 1 }
  0xb0   :  { %v64_v15 = vadd.f32 %v63_v13, %v62_v11  ;;  %v55_v16 = vadd.f32 %v54_v14, %v53_v12 }
  0xb2   :  { %92 = vpush %v55_v16  ;;  %v65_v17 = vrot.slane %v64_v15, 1 }
  0xb4   :  { %v66_v18 = vadd.f32 %v65_v17, %v64_v15 }
  0xb6   :  { %94 = vpush %v66_v18 }
  0xe3   :  { %s93_s0 = spop %92 }
  0xe4   :  { %71 = sst [smem:[#allocation7]] %s93_s0 }
  0xe7   :  { %s95_s1 = spop %94 }
  0xe8   :  { %75 = sst [smem:[#allocation7 + $0x1]] %s95_s1 }
  0xe9   :  { %83 = dma.smem_to_hbm %s156_s19, 16, %s183_s2, [#allocation4]  }
  0xea   :  { %152 = dma.done.wait [#allocation4], 16  }
  0xeb   :  { %153 = vsyncadd [#allocation4], 4294967280 }
  0xec   :  { %87 = sfence }
  0xed   :  { %88 = vsyncpa [#allocation3], 1 }
  0xee   :  { %89 = vsyncpa [#allocation6], 1 }
  0xef   :  { %90 = vsyncpa [#allocation4], 1 }

</bundles_post_ra>
